<compile_context>
chip_gen: v7x
topology: tpu7x:2x2x1
jax: 0.10.0
libtpu: 0.0.40
codegen_flags: <defaults>
</compile_context>

<pallas_src>
import jax
import jax.numpy as jnp
import numpy as np
from jax.experimental import pallas as pl
from jax.experimental.pallas import tpu as pltpu

# ---------------- model config (toy sizes, consistent with the module) -------
HIDDEN = 32
NUM_HEADS = 4
NUM_KV_HEADS = 2
HEAD_DIM = HIDDEN // NUM_HEADS          # 8
Q_SIZE = NUM_HEADS * HEAD_DIM           # 32
KV_SIZE = NUM_KV_HEADS * HEAD_DIM       # 16
QKV_OUT = Q_SIZE + 2 * KV_SIZE          # 64
QK_SIZE = Q_SIZE + KV_SIZE              # 48  (q|k slab that gets LN + RoPE)
N_LN_HEADS = NUM_HEADS + NUM_KV_HEADS   # 6
REP = NUM_HEADS // NUM_KV_HEADS         # 2
SCALE = HEAD_DIM ** -0.5
EPS = 1e-5
ROPE_THETA = 10000.0
SEQ = 8                                 # T
H_T = NUM_HEADS * SEQ                   # 32 score columns (all heads side by side)
OUT_PAD = 128                           # lane-dense output width (full vreg)
CONST_W = QK_SIZE                       # 48: widest structure block needed


# ------------------- packed constants slab: layout + builder -----------------
def _round8(n):
    return -(-n // 8) * 8


_CONST_BLOCKS = (
    ("seg_mean", QK_SIZE, N_LN_HEADS),   # per-head mean weights (1/D in blocks)
    ("expand",   N_LN_HEADS, QK_SIZE),   # broadcast per-head scalar -> head cols
    ("ln_wb",    2, QK_SIZE),            # row 0: LN scale (q part * SCALE), row 1: bias
    ("rot",      QK_SIZE, QK_SIZE),      # block-diag NeoX rotate-half (y @ rot)
    ("rep_k",    QK_SIZE, Q_SIZE),       # select roped k cols, replicate kv->q heads
    ("rep_v",    QKV_OUT, Q_SIZE),       # select raw v cols,  replicate kv->q heads
    ("tile_r",   H_T, SEQ),              # row tiling: Jt[h*T+s, s] = 1
    ("blk_sq",   H_T, Q_SIZE),           # block mask [r//T == c//D]
    ("causal",   SEQ, H_T),              # additive causal bias, tiled per head
    ("psum",     H_T, NUM_HEADS),        # per-head probability-sum matrix
)
_OFF = {}
_rows = 0
for _name, _h, _w in _CONST_BLOCKS:
    _OFF[_name] = _rows
    _rows += _round8(_h)
CONST_ROWS = _rows


def _build_static_consts():
    c = np.zeros((CONST_ROWS, CONST_W), np.float32)
    D, T = HEAD_DIM, SEQ

    r0 = _OFF["seg_mean"]
    for h in range(N_LN_HEADS):
        c[r0 + h * D:r0 + (h + 1) * D, h] = 1.0 / D

    r0 = _OFF["expand"]
    for h in range(N_LN_HEADS):
        c[r0 + h, h * D:(h + 1) * D] = 1.0

    # y @ rot == NeoX rotate_half(y), per 8-wide head block
    r0 = _OFF["rot"]
    for h in range(N_LN_HEADS):
        for j in range(D // 2):
            c[r0 + h * D + j + D // 2, h * D + j] = -1.0
            c[r0 + h * D + j,          h * D + j + D // 2] = 1.0

    r0 = _OFF["rep_k"]
    for h in range(NUM_HEADS):
        g = h // REP
        for d in range(D):
            c[r0 + Q_SIZE + g * D + d, h * D + d] = 1.0

    r0 = _OFF["rep_v"]
    for h in range(NUM_HEADS):
        g = h // REP
        for d in range(D):
            c[r0 + Q_SIZE + KV_SIZE + g * D + d, h * D + d] = 1.0

    r0 = _OFF["tile_r"]
    for h in range(NUM_HEADS):
        for s in range(T):
            c[r0 + h * T + s, s] = 1.0

    r0 = _OFF["blk_sq"]
    for h in range(NUM_HEADS):
        c[r0 + h * T:r0 + (h + 1) * T, h * D:(h + 1) * D] = 1.0

    r0 = _OFF["causal"]
    for h in range(NUM_HEADS):
        for t in range(T):
            for s in range(T):
                c[r0 + t, h * T + s] = 0.0 if s <= t else -1e30

    r0 = _OFF["psum"]
    for h in range(NUM_HEADS):
        c[r0 + h * T:r0 + (h + 1) * T, h] = 1.0
    return c


# ---------------------------- Pallas kernel ----------------------------------
def chameleon_attn_kernel(h_ref, wqkv_ref, wo_ref, cs_ref, c_ref, o_ref):
    T = h_ref.shape[0]

    # --- constant sub-blocks (static, aligned slices of the packed slab) -----
    seg_mean = c_ref[_OFF["seg_mean"]:_OFF["seg_mean"] + QK_SIZE, :N_LN_HEADS]  # (48, 6)
    expand = c_ref[_OFF["expand"]:_OFF["expand"] + N_LN_HEADS, :QK_SIZE]        # (6, 48)
    exp_hd = c_ref[_OFF["expand"]:_OFF["expand"] + NUM_HEADS, :Q_SIZE]          # (4, 32)
    ln_w = c_ref[_OFF["ln_wb"]:_OFF["ln_wb"] + 1, :QK_SIZE]                     # (1, 48)
    ln_b = c_ref[_OFF["ln_wb"] + 1:_OFF["ln_wb"] + 2, :QK_SIZE]                 # (1, 48)
    rot = c_ref[_OFF["rot"]:_OFF["rot"] + QK_SIZE, :QK_SIZE]                    # (48, 48)
    rep_k = c_ref[_OFF["rep_k"]:_OFF["rep_k"] + QK_SIZE, :Q_SIZE]               # (48, 32)
    rep_v = c_ref[_OFF["rep_v"]:_OFF["rep_v"] + QKV_OUT, :Q_SIZE]               # (64, 32)
    tile_r = c_ref[_OFF["tile_r"]:_OFF["tile_r"] + H_T, :SEQ]                   # (32, 8)
    blk_sq = c_ref[_OFF["blk_sq"]:_OFF["blk_sq"] + H_T, :Q_SIZE]                # (32, 32)
    causal = c_ref[_OFF["causal"]:_OFF["causal"] + SEQ, :H_T]                   # (8, 32)
    psum = c_ref[_OFF["psum"]:_OFF["psum"] + H_T, :NUM_HEADS]                   # (32, 4)

    cos = cs_ref[0:T, :]                                                        # (8, 48)
    sin = cs_ref[T:2 * T, :]                                                    # (8, 48)

    # --- qkv projection (MXU) -------------------------------------------------
    x = h_ref[...]
    qkv = jnp.dot(x, wqkv_ref[...], preferred_element_type=jnp.float32)         # (8, 64)
    qk = qkv[:, :QK_SIZE]                                                        # (8, 48) offset-0

    # --- per-head ChameleonLayerNorm on the whole q|k slab (segment matmuls) --
    mu = jnp.dot(qk, seg_mean, preferred_element_type=jnp.float32)               # (8, 6)
    mu_full = jnp.dot(mu, expand, preferred_element_type=jnp.float32)            # (8, 48)
    cen = qk - mu_full
    var = jnp.dot(cen * cen, seg_mean, preferred_element_type=jnp.float32)       # (8, 6)
    var_full = jnp.dot(var, expand, preferred_element_type=jnp.float32)          # (8, 48)
    y = cen * jax.lax.rsqrt(var_full + EPS)
    y = y * ln_w + ln_b            # q-head rows are pre-scaled by head_dim**-0.5

    # --- NeoX RoPE on the whole slab: y*cos + (y @ R_blockdiag)*sin -----------
    y = y * cos + jnp.dot(y, rot, preferred_element_type=jnp.float32) * sin      # (8, 48)

    q = y[:, :Q_SIZE]                                                            # (8, 32) offset-0

    # --- build block-diagonal K-rows / V-rows for all heads (GQA replicated) --
    k_rep = jnp.dot(y, rep_k, preferred_element_type=jnp.float32)                # (8, 32)
    v_rep = jnp.dot(qkv, rep_v, preferred_element_type=jnp.float32)              # (8, 32)
    krows = jnp.dot(tile_r, k_rep, preferred_element_type=jnp.float32) * blk_sq  # (32, 32)
    vrows = jnp.dot(tile_r, v_rep, preferred_element_type=jnp.float32) * blk_sq  # (32, 32)

    # --- scores for all heads in one q @ K^T matmul + precomputed causal bias -
    s = jax.lax.dot_general(q, krows, (((1,), (1,)), ((), ())),
                            preferred_element_type=jnp.float32) + causal         # (8, 32)

    # --- softmax: one global row max (exact; LN-bounded scores), per-head sums
    m = jnp.max(s, axis=-1, keepdims=True)                                       # (8, 1)
    p = jnp.exp(s - m)                                                           # (8, 32)
    pv = jnp.dot(p, vrows, preferred_element_type=jnp.float32)                   # (8, 32)
    l = jnp.dot(p, psum, preferred_element_type=jnp.float32)                     # (8, 4)
    # exact reciprocal keeps the 1e-3 check comfortable; approx=True is the
    # lever once this is scaled up.
    r = pl.reciprocal(l)
    attn = pv * jnp.dot(r, exp_hd, preferred_element_type=jnp.float32)           # (8, 32)

    # --- output projection into a lane-dense (T, 128) slab --------------------
    o_ref[...] = jnp.dot(attn, wo_ref[...],
                         preferred_element_type=jnp.float32).astype(o_ref.dtype)


# ------------------------------ host-side glue --------------------------------
def prepare_params(wqkv, wo, qnw, qnb, knw, knb):
    """One-time packing of weights + structure constants for the kernel."""
    consts = jnp.asarray(_build_static_consts())
    ln_w = jnp.concatenate([(qnw * SCALE).reshape(-1), knw.reshape(-1)])[None, :]
    ln_b = jnp.concatenate([(qnb * SCALE).reshape(-1), knb.reshape(-1)])[None, :]
    r0 = _OFF["ln_wb"]
    consts = consts.at[r0:r0 + 2, :QK_SIZE].set(jnp.concatenate([ln_w, ln_b], axis=0))
    wo_pad = jnp.zeros((Q_SIZE, OUT_PAD), jnp.float32).at[:, :HIDDEN].set(wo)
    return {"wqkv": wqkv, "wo_pad": wo_pad, "consts": consts}


def _chameleon_attention_impl(params, hidden, positions):
    T = hidden.shape[0]
    assert T == SEQ, "constants slab was built for SEQ tokens"

    # full-width rotary tables (one array, one DMA); fuses into the jit program
    inv_freq = 1.0 / (ROPE_THETA ** (jnp.arange(0, HEAD_DIM, 2, dtype=jnp.float32)
                                     / HEAD_DIM))
    freqs = positions.astype(jnp.float32)[:, None] * inv_freq[None, :]           # (T, D/2)
    cos = jnp.cos(freqs)
    sin = jnp.sin(freqs)
    cos_full = jnp.tile(jnp.concatenate([cos, cos], axis=-1), (1, N_LN_HEADS))   # (T, 48)
    sin_full = jnp.tile(jnp.concatenate([sin, sin], axis=-1), (1, N_LN_HEADS))   # (T, 48)
    cos_sin = jnp.concatenate([cos_full, sin_full], axis=0)                      # (2T, 48)

    vmem = pl.BlockSpec(memory_space=pltpu.MemorySpace.VMEM)
    out_pad = pl.pallas_call(
        chameleon_attn_kernel,
        out_shape=jax.ShapeDtypeStruct((T, OUT_PAD), jnp.float32),
        in_specs=[vmem] * 5,
        out_specs=vmem,
    )(hidden, params["wqkv"], params["wo_pad"], cos_sin, params["consts"])
    return out_pad[:, :HIDDEN]


# jit the wrapper so rotary prep + pallas_call + output slice dispatch as one
# XLA program (removes per-op host dispatch overhead at this toy size).
chameleon_attention = jax.jit(_chameleon_attention_impl)


# ---------------------------- pure-JAX reference ------------------------------
def reference(hidden, wqkv, qnw, qnb, knw, knb, cos, sin, wo):
    T = hidden.shape[0]
    qkv = hidden @ wqkv
    q = qkv[:, :Q_SIZE].reshape(T, NUM_HEADS, HEAD_DIM)
    k = qkv[:, Q_SIZE:Q_SIZE + KV_SIZE].reshape(T, NUM_KV_HEADS, HEAD_DIM)
    v = qkv[:, Q_SIZE + KV_SIZE:].reshape(T, NUM_KV_HEADS, HEAD_DIM)

    def ln(x, w, b):
        mu = x.mean(-1, keepdims=True)
        var = ((x - mu) ** 2).mean(-1, keepdims=True)
        return (x - mu) * jax.lax.rsqrt(var + EPS) * w + b

    def rope(x):
        x1, x2 = x[..., :HEAD_DIM // 2], x[..., HEAD_DIM // 2:]
        c, s = cos[:, None, :], sin[:, None, :]
        return jnp.concatenate([x1 * c - x2 * s, x2 * c + x1 * s], -1)

    q = rope(ln(q, qnw, qnb))
    k = rope(ln(k, knw, knb))

    rep = NUM_HEADS // NUM_KV_HEADS
    kf = jnp.repeat(k, rep, axis=1)
    vf = jnp.repeat(v, rep, axis=1)
    s = jnp.einsum('tnd,snd->nts', q, kf) * SCALE
    mask = jnp.tril(jnp.ones((T, T), dtype=bool))
    s = jnp.where(mask[None], s, -1e30)
    p = jax.nn.softmax(s, axis=-1)
    attn = jnp.einsum('nts,snd->tnd', p, vf).reshape(T, Q_SIZE)
    return attn @ wo


# ------------------------------------ main ------------------------------------
if __name__ == "__main__":
    key = jax.random.PRNGKey(0)
    keys = jax.random.split(key, 8)

    hidden = jax.random.normal(keys[0], (SEQ, HIDDEN), dtype=jnp.float32)
    wqkv = jax.random.normal(keys[1], (HIDDEN, QKV_OUT), dtype=jnp.float32) * 0.05
    wo = jax.random.normal(keys[2], (Q_SIZE, HIDDEN), dtype=jnp.float32) * 0.05
    qnw = 1.0 + 0.1 * jax.random.normal(keys[3], (NUM_HEADS, HEAD_DIM), dtype=jnp.float32)
    qnb = 0.05 * jax.random.normal(keys[4], (NUM_HEADS, HEAD_DIM), dtype=jnp.float32)
    knw = 1.0 + 0.1 * jax.random.normal(keys[5], (NUM_KV_HEADS, HEAD_DIM), dtype=jnp.float32)
    knb = 0.05 * jax.random.normal(keys[6], (NUM_KV_HEADS, HEAD_DIM), dtype=jnp.float32)
    positions = jnp.arange(SEQ, dtype=jnp.int32)

    params = prepare_params(wqkv, wo, qnw, qnb, knw, knb)
    out = chameleon_attention(params, hidden, positions)
    out = jax.block_until_ready(out)

    # reference rotary tables (T, HEAD_DIM/2)
    inv_freq = 1.0 / (ROPE_THETA ** (jnp.arange(0, HEAD_DIM, 2, dtype=jnp.float32)
                                     / HEAD_DIM))
    freqs = positions.astype(jnp.float32)[:, None] * inv_freq[None, :]
    cos = jnp.cos(freqs)
    sin = jnp.sin(freqs)
    ref = reference(hidden, wqkv, qnw, qnb, knw, knb, cos, sin, wo)

    np.testing.assert_allclose(np.asarray(out), np.asarray(ref), rtol=1e-3, atol=1e-3)
    print("KERNEL_OK")
</pallas_src>

<mosaic_0001>
module attributes {stable_mosaic.version = 11 : i64} {
  func.func @chameleon_attn_kernel(%arg0: memref<8x32xf32, #tpu.memory_space<vmem>>, %arg1: memref<32x64xf32, #tpu.memory_space<vmem>>, %arg2: memref<32x128xf32, #tpu.memory_space<vmem>>, %arg3: memref<16x48xf32, #tpu.memory_space<vmem>>, %arg4: memref<328x48xf32, #tpu.memory_space<vmem>>, %arg5: memref<8x128xf32, #tpu.memory_space<vmem>>) attributes {dimension_semantics = [], scalar_prefetch = 0 : i64, scratch_operands = 0 : i64, tpu.core_type = #tpu.core_type<tc>} {
    %c0 = arith.constant 0 : index
    %c0_0 = arith.constant 0 : index
    %0 = vector.load %arg4[%c0, %c0_0] : memref<328x48xf32, #tpu.memory_space<vmem>>, vector<48x6xf32>
    %c48 = arith.constant 48 : index
    %c0_1 = arith.constant 0 : index
    %1 = vector.load %arg4[%c48, %c0_1] : memref<328x48xf32, #tpu.memory_space<vmem>>, vector<6x48xf32>
    %c48_2 = arith.constant 48 : index
    %c0_3 = arith.constant 0 : index
    %2 = vector.load %arg4[%c48_2, %c0_3] : memref<328x48xf32, #tpu.memory_space<vmem>>, vector<4x32xf32>
    %c56 = arith.constant 56 : index
    %c0_4 = arith.constant 0 : index
    %3 = vector.load %arg4[%c56, %c0_4] : memref<328x48xf32, #tpu.memory_space<vmem>>, vector<1x48xf32>
    %c57 = arith.constant 57 : index
    %c0_5 = arith.constant 0 : index
    %4 = vector.load %arg4[%c57, %c0_5] : memref<328x48xf32, #tpu.memory_space<vmem>>, vector<1x48xf32>
    %c64 = arith.constant 64 : index
    %c0_6 = arith.constant 0 : index
    %5 = vector.load %arg4[%c64, %c0_6] : memref<328x48xf32, #tpu.memory_space<vmem>>, vector<48x48xf32>
    %c112 = arith.constant 112 : index
    %c0_7 = arith.constant 0 : index
    %6 = vector.load %arg4[%c112, %c0_7] : memref<328x48xf32, #tpu.memory_space<vmem>>, vector<48x32xf32>
    %c160 = arith.constant 160 : index
    %c0_8 = arith.constant 0 : index
    %7 = vector.load %arg4[%c160, %c0_8] : memref<328x48xf32, #tpu.memory_space<vmem>>, vector<64x32xf32>
    %c224 = arith.constant 224 : index
    %c0_9 = arith.constant 0 : index
    %8 = vector.load %arg4[%c224, %c0_9] : memref<328x48xf32, #tpu.memory_space<vmem>>, vector<32x8xf32>
    %c256 = arith.constant 256 : index
    %c0_10 = arith.constant 0 : index
    %9 = vector.load %arg4[%c256, %c0_10] : memref<328x48xf32, #tpu.memory_space<vmem>>, vector<32x32xf32>
    %c288 = arith.constant 288 : index
    %c0_11 = arith.constant 0 : index
    %10 = vector.load %arg4[%c288, %c0_11] : memref<328x48xf32, #tpu.memory_space<vmem>>, vector<8x32xf32>
    %c296 = arith.constant 296 : index
    %c0_12 = arith.constant 0 : index
    %11 = vector.load %arg4[%c296, %c0_12] : memref<328x48xf32, #tpu.memory_space<vmem>>, vector<32x4xf32>
    %c0_13 = arith.constant 0 : index
    %c0_14 = arith.constant 0 : index
    %12 = vector.load %arg3[%c0_13, %c0_14] : memref<16x48xf32, #tpu.memory_space<vmem>>, vector<8x48xf32>
    %c8 = arith.constant 8 : index
    %c0_15 = arith.constant 0 : index
    %13 = vector.load %arg3[%c8, %c0_15] : memref<16x48xf32, #tpu.memory_space<vmem>>, vector<8x48xf32>
    %c0_16 = arith.constant 0 : index
    %c0_17 = arith.constant 0 : index
    %14 = vector.load %arg0[%c0_16, %c0_17] : memref<8x32xf32, #tpu.memory_space<vmem>>, vector<8x32xf32>
    %c0_18 = arith.constant 0 : index
    %c0_19 = arith.constant 0 : index
    %15 = vector.load %arg1[%c0_18, %c0_19] : memref<32x64xf32, #tpu.memory_space<vmem>>, vector<32x64xf32>
    %cst = arith.constant dense<0.000000e+00> : vector<8x64xf32>
    %16 = tpu.matmul %14, %15, %cst {dimension_numbers = #tpu.dot_dimension_numbers<[1], [0], [0], [1], [0, 0, 1, 1], [], []>} : vector<8x32xf32>, vector<32x64xf32>, vector<8x64xf32> -> vector<8x64xf32>
    %17 = vector.extract_strided_slice %16 {offsets = [0, 0], sizes = [8, 48], strides = [1, 1]} : vector<8x64xf32> to vector<8x48xf32>
    %cst_20 = arith.constant dense<0.000000e+00> : vector<8x6xf32>
    %18 = tpu.matmul %17, %0, %cst_20 {dimension_numbers = #tpu.dot_dimension_numbers<[1], [0], [0], [1], [0, 0, 1, 1], [], []>} : vector<8x48xf32>, vector<48x6xf32>, vector<8x6xf32> -> vector<8x6xf32>
    %cst_21 = arith.constant dense<0.000000e+00> : vector<8x48xf32>
    %19 = tpu.matmul %18, %1, %cst_21 {dimension_numbers = #tpu.dot_dimension_numbers<[1], [0], [0], [1], [0, 0, 1, 1], [], []>} : vector<8x6xf32>, vector<6x48xf32>, vector<8x48xf32> -> vector<8x48xf32>
    %20 = arith.subf %17, %19 : vector<8x48xf32>
    %21 = arith.mulf %20, %20 : vector<8x48xf32>
    %cst_22 = arith.constant dense<0.000000e+00> : vector<8x6xf32>
    %22 = tpu.matmul %21, %0, %cst_22 {dimension_numbers = #tpu.dot_dimension_numbers<[1], [0], [0], [1], [0, 0, 1, 1], [], []>} : vector<8x48xf32>, vector<48x6xf32>, vector<8x6xf32> -> vector<8x6xf32>
    %cst_23 = arith.constant dense<0.000000e+00> : vector<8x48xf32>
    %23 = tpu.matmul %22, %1, %cst_23 {dimension_numbers = #tpu.dot_dimension_numbers<[1], [0], [0], [1], [0, 0, 1, 1], [], []>} : vector<8x6xf32>, vector<6x48xf32>, vector<8x48xf32> -> vector<8x48xf32>
    %cst_24 = arith.constant 9.99999974E-6 : f32
    %24 = vector.broadcast %cst_24 : f32 to vector<8x48xf32>
    %25 = arith.addf %23, %24 : vector<8x48xf32>
    %26 = math.rsqrt %25 : vector<8x48xf32>
    %27 = arith.mulf %20, %26 : vector<8x48xf32>
    %28 = vector.broadcast %3 : vector<1x48xf32> to vector<8x48xf32>
    %29 = arith.mulf %27, %28 : vector<8x48xf32>
    %30 = vector.broadcast %4 : vector<1x48xf32> to vector<8x48xf32>
    %31 = arith.addf %29, %30 : vector<8x48xf32>
    %32 = arith.mulf %31, %12 : vector<8x48xf32>
    %cst_25 = arith.constant dense<0.000000e+00> : vector<8x48xf32>
    %33 = tpu.matmul %31, %5, %cst_25 {dimension_numbers = #tpu.dot_dimension_numbers<[1], [0], [0], [1], [0, 0, 1, 1], [], []>} : vector<8x48xf32>, vector<48x48xf32>, vector<8x48xf32> -> vector<8x48xf32>
    %34 = arith.mulf %33, %13 : vector<8x48xf32>
    %35 = arith.addf %32, %34 : vector<8x48xf32>
    %36 = vector.extract_strided_slice %35 {offsets = [0, 0], sizes = [8, 32], strides = [1, 1]} : vector<8x48xf32> to vector<8x32xf32>
    %cst_26 = arith.constant dense<0.000000e+00> : vector<8x32xf32>
    %37 = tpu.matmul %35, %6, %cst_26 {dimension_numbers = #tpu.dot_dimension_numbers<[1], [0], [0], [1], [0, 0, 1, 1], [], []>} : vector<8x48xf32>, vector<48x32xf32>, vector<8x32xf32> -> vector<8x32xf32>
    %cst_27 = arith.constant dense<0.000000e+00> : vector<8x32xf32>
    %38 = tpu.matmul %16, %7, %cst_27 {dimension_numbers = #tpu.dot_dimension_numbers<[1], [0], [0], [1], [0, 0, 1, 1], [], []>} : vector<8x64xf32>, vector<64x32xf32>, vector<8x32xf32> -> vector<8x32xf32>
    %cst_28 = arith.constant dense<0.000000e+00> : vector<32x32xf32>
    %39 = tpu.matmul %8, %37, %cst_28 {dimension_numbers = #tpu.dot_dimension_numbers<[1], [0], [0], [1], [0, 0, 1, 1], [], []>} : vector<32x8xf32>, vector<8x32xf32>, vector<32x32xf32> -> vector<32x32xf32>
    %40 = arith.mulf %39, %9 : vector<32x32xf32>
    %cst_29 = arith.constant dense<0.000000e+00> : vector<32x32xf32>
    %41 = tpu.matmul %8, %38, %cst_29 {dimension_numbers = #tpu.dot_dimension_numbers<[1], [0], [0], [1], [0, 0, 1, 1], [], []>} : vector<32x8xf32>, vector<8x32xf32>, vector<32x32xf32> -> vector<32x32xf32>
    %42 = arith.mulf %41, %9 : vector<32x32xf32>
    %cst_30 = arith.constant dense<0.000000e+00> : vector<8x32xf32>
    %43 = tpu.matmul %36, %40, %cst_30 {dimension_numbers = #tpu.dot_dimension_numbers<[1], [1], [0], [0], [0, 0, 1, 0], [], []>} : vector<8x32xf32>, vector<32x32xf32>, vector<8x32xf32> -> vector<8x32xf32>
    %44 = arith.addf %43, %10 : vector<8x32xf32>
    %cst_31 = arith.constant dense<0xFF800000> : vector<8xf32>
    %45 = vector.multi_reduction <maximumf>, %44, %cst_31 [1] : vector<8x32xf32> to vector<8xf32>
    %46 = vector.shape_cast %45 : vector<8xf32> to vector<8x1xf32>
    %47 = vector.broadcast %46 : vector<8x1xf32> to vector<8x32xf32>
    %48 = arith.subf %44, %47 : vector<8x32xf32>
    %49 = math.exp %48 : vector<8x32xf32>
    %cst_32 = arith.constant dense<0.000000e+00> : vector<8x32xf32>
    %50 = tpu.matmul %49, %42, %cst_32 {dimension_numbers = #tpu.dot_dimension_numbers<[1], [0], [0], [1], [0, 0, 1, 1], [], []>} : vector<8x32xf32>, vector<32x32xf32>, vector<8x32xf32> -> vector<8x32xf32>
    %cst_33 = arith.constant dense<0.000000e+00> : vector<8x4xf32>
    %51 = tpu.matmul %49, %11, %cst_33 {dimension_numbers = #tpu.dot_dimension_numbers<[1], [0], [0], [1], [0, 0, 1, 1], [], []>} : vector<8x32xf32>, vector<32x4xf32>, vector<8x4xf32> -> vector<8x4xf32>
    %52 = tpu.reciprocal %51 : vector<8x4xf32> -> vector<8x4xf32>
    %cst_34 = arith.constant dense<0.000000e+00> : vector<8x32xf32>
    %53 = tpu.matmul %52, %2, %cst_34 {dimension_numbers = #tpu.dot_dimension_numbers<[1], [0], [0], [1], [0, 0, 1, 1], [], []>} : vector<8x4xf32>, vector<4x32xf32>, vector<8x32xf32> -> vector<8x32xf32>
    %54 = arith.mulf %50, %53 : vector<8x32xf32>
    %c0_35 = arith.constant 0 : index
    %c0_36 = arith.constant 0 : index
    %55 = vector.load %arg2[%c0_35, %c0_36] : memref<32x128xf32, #tpu.memory_space<vmem>>, vector<32x128xf32>
    %cst_37 = arith.constant dense<0.000000e+00> : vector<8x128xf32>
    %56 = tpu.matmul %54, %55, %cst_37 {dimension_numbers = #tpu.dot_dimension_numbers<[1], [0], [0], [1], [0, 0, 1, 1], [], []>} : vector<8x32xf32>, vector<32x128xf32>, vector<8x128xf32> -> vector<8x128xf32>
    %c0_38 = arith.constant 0 : index
    %c0_39 = arith.constant 0 : index
    %57 = vector.load %arg5[%c0_38, %c0_39] : memref<8x128xf32, #tpu.memory_space<vmem>>, vector<8x128xf32>
    tpu.vector_store %arg5[%c0_38, %c0_39], %56 {strides = array<i32>} : memref<8x128xf32, #tpu.memory_space<vmem>>, vector<8x128xf32>,
    return
  }
}

</mosaic_0001>

<bundles_post_ra>
// kernel: tile.14
= control target key start
LH: loop header
LB: loop body
LE: loop exit
PB: predicated region body
PF: predicated region fallthrough
CT: control target
= control target key end

     0   :  { %vm4_vm0 = vcmask 1047556   ;;  %s73_s14 = smov 40   ;;  %s74_s19 = smov 24   ;;  %vm6_vm1 = vcmask 64512   ;;  %vm16_vm2 = vcmask 392512   ;;  %vm26_vm3 = vcmask 326912   ;;  %s148_s0 = inlined_call_operand.vmem [shape: f32[8,6,8], index: 0, kind: input, shape index: {}]   ;;  %s149_s1 = inlined_call_operand.vmem [shape: f32[8,48], index: 1, kind: output, shape index: {}]  }
   0x1   :  { %v58_v0 = vld [vmem:[%s148_s0 + $0x5] ss:$8 sm:$0xf]   ;;  %v62_v3 = vld [vmem:[%s148_s0 + $0x3] ss:$8 sm:$0xf]  }
   0x2   :  { %v59_v1 = vld [vmem:[%s148_s0 + $0x5] ss:$8 sm:$0xf0]   ;;  %v63_v4 = vld [vmem:[%s148_s0 + $0x3] ss:$8 sm:$0xf0]  }
   0x3   :  { %v13_v2 = vsel %vm4_vm0, %v59_v1, %v58_v0  ;;  %v33_v5 = vsel %vm4_vm0, %v63_v4, %v62_v3  ;;  %v60_v6 = vld [vmem:[%s148_s0 + $0x4] ss:$8 sm:$0xf]   ;;  %v64_v9 = vld [vmem:[%s148_s0 + $0x2] ss:$8 sm:$0xf]  }
   0x4   :  { %14 = vrot.lane.b32.xlu0 %v13_v2, %s73_s14  ;;  %v61_v7 = vld [vmem:[%s148_s0 + $0x4] ss:$8 sm:$0xf0]   ;;  %34 = vrot.lane.b32.xlu1 %v33_v5, %s74_s19  ;;  %v65_v10 = vld [vmem:[%s148_s0 + $0x2] ss:$8 sm:$0xf0]  }
   0x5   :  { %v23_v8 = vsel %vm4_vm0, %v61_v7, %v60_v6  ;;  %v66_v11 = vld [vmem:[%s148_s0 + $0x1] ss:$8 sm:$0xf]   ;;  %v43_v12 = vsel %vm4_vm0, %v65_v10, %v64_v9  ;;  %s75_s28 = smov 32   ;;  %s77_s6 = smov 8   ;;  %vm36_vm4 = vcmask 261312  }
   0x6   :  { %v67_v13 = vld [vmem:[%s148_s0 + $0x1] ss:$8 sm:$0xf0]   ;;  %v2_v14 = vld [vmem:[%s148_s0] ss:$8 sm:$0xf]  }
   0x7   :  { %v3_v15 = vld [vmem:[%s148_s0] ss:$8 sm:$0xf0]   ;;  %s76_s0 = smov 16   ;;  %v53_v16 = vsel %vm4_vm0, %v67_v13, %v66_v11  ;;  %vm46_vm5 = vcmask 195712   ;;  %vm56_vm6 = vcmask 130112  }
   0x8   :  { %24 = vrot.lane.b32.xlu0 %v23_v8, %s75_s28  ;;  %44 = vrot.lane.b32.xlu1 %v43_v12, %s76_s0  ;;  %v5_v17 = vsel %vm4_vm0, %v3_v15, %v2_v14 }
   0x9   :  { %7 = vst.msk [vmem:[%s149_s1] sm:$0xff] %vm6_vm1, %v5_v17  }
   0xc   :  { %54 = vrot.lane.b32.xlu0 %v53_v16, %s77_s6 }
  0x76   :  { %v15_v18 = vpop.permute.xlu0 %14   ;;  %v35_v19 = vpop.permute.xlu1 %34  }
  0x77   :  { %17 = vst.msk [vmem:[%s149_s1] sm:$0xff] %vm16_vm2, %v15_v18  }
  0x7a   :  { %v25_v20 = vpop.permute.xlu0 %24   ;;  %v45_v21 = vpop.permute.xlu1 %44  }
  0x7b   :  { %27 = vst.msk [vmem:[%s149_s1] sm:$0xff] %vm26_vm3, %v25_v20  }
  0x7c   :  { %37 = vst.msk [vmem:[%s149_s1] sm:$0xff] %vm36_vm4, %v35_v19  }
  0x7d   :  { %47 = vst.msk [vmem:[%s149_s1] sm:$0xff] %vm46_vm5, %v45_v21  }
  0x7e   :  { %v55_v22 = vpop.permute.xlu0 %54  }
  0x7f   :  { %57 = vst.msk [vmem:[%s149_s1] sm:$0xff] %vm56_vm6, %v55_v22  }

// kernel: _chameleon_attention_impl.1
= control target key start
LH: loop header
LB: loop body
LE: loop exit
PB: predicated region body
PF: predicated region fallthrough
CT: control target
= control target key end

     0   :  { %v1662_v3 = vmov 0.0|0.0   ;;  %vm1663_vm0 = vmmov 0   ;;  %v1664_v6 = vmov 0.0   ;;  %s1950_s0 = inlined_call_operand.vmem [shape: f32[8,32], index: 0, kind: input, shape index: {}]   ;;  %s1951_s1 = inlined_call_operand.vmem [shape: f32[32,64], index: 1, kind: input, shape index: {}]   ;;  %s1952_s2 = inlined_call_operand.vmem [shape: f32[32,128], index: 2, kind: input, shape index: {}]   ;;  %s1953_s3 = inlined_call_operand.vmem [shape: f32[16,48], index: 3, kind: input, shape index: {}]   ;;  %s1954_s4 = inlined_call_operand.vmem [shape: f32[328,48], index: 4, kind: input, shape index: {}]   ;;  %s1955_s5 = inlined_call_operand.hbm [shape: f32[8,128], index: 5, kind: output, shape index: {}]  }
   0x1   :  { %v67_v0 = vld [vmem:[%s1951_s1] sm:$0xff]  ;;  %v68_v1 = vld [vmem:[%s1951_s1 + $0x8] sm:$0xff]  ;;  %v69_v2 = vld [vmem:[%s1951_s1 + $0x10] sm:$0xff]  ;;  %1548 = vmatprep.subr.bf16.mxu0 %v1662_v3  ;;  %1391 = vmatprep.mubr.msk.f32.mxu0 %vm1663_vm0, %v1664_v6 }
   0x2   :  { %v1549_v4 = vpack.c.bf16 %v68_v1, %v67_v0  ;;  %v70_v5 = vld [vmem:[%s1951_s1 + $0x18] sm:$0xff]  ;;  %v21_v7 = vld [vmem:[%s1954_s4] sm:$0xff]  ;;  %1554 = vmatprep.subr.bf16.mxu1 %v1662_v3  ;;  %v22_v8 = vld [vmem:[%s1954_s4 + $0x8] sm:$0xff]  ;;  %1406 = vmatprep.mubr.msk.f32.mxu1 %vm1663_vm0, %v1664_v6 }
   0x3   :  { %v23_v9 = vld [vmem:[%s1954_s4 + $0x10] sm:$0xff]  ;;  %v24_v10 = vld [vmem:[%s1954_s4 + $0x18] sm:$0xff]  ;;  %v1552_v11 = vpack.c.bf16 %v70_v5, %v69_v2  ;;  %v1555_v12 = vpack.c.bf16 %v22_v8, %v21_v7 }
   0x4   :  { %1550 = vmatpush3.bf16.msra.mxu0 %v1549_v4 }
   0x5   :  { %10 = vsyncpa [#allocation3], 0  ;;  %1551 = vmatprep.subr.bf16.mxu0 %v1662_v3  ;;  %1556 = vmatpush3.bf16.msra.mxu1 %v1555_v12  ;;  %v1558_v13 = vpack.c.bf16 %v24_v10, %v23_v9  ;;  %v25_v14 = vld [vmem:[%s1954_s4 + $0x20] sm:$0xff]  ;;  %v26_v15 = vld [vmem:[%s1954_s4 + $0x28] sm:$0xff]  ;;  %vm71_vm1 = vcmask 261120   ;;  %vm145_vm2 = vcmask 392192  }
   0x6   :  { %1557 = vmatprep.subr.bf16.mxu1 %v1662_v3  ;;  %v66_v16 = vld [vmem:[%s1950_s0] sm:$0xff]  ;;  %v1561_v17 = vpack.c.bf16 %v26_v15, %v25_v14  ;;  %v27_v20 = vld [vmem:[%s1954_s4 + $0x30] sm:$0x3f]  ;;  %vm223_vm3 = vcmask 1045504   ;;  %vm219_vm4 = vcmask 48128   ;;  %v32_v30 = vld [vmem:[%s1954_s4 + $0x48] sm:$0xff] }
   0x7   :  { %v31_v29 = vld [vmem:[%s1954_s4 + $0x40] sm:$0xff]  ;;  %v33_v32 = vld [vmem:[%s1954_s4 + $0x50] sm:$0xff]  ;;  %v34_v33 = vld [vmem:[%s1954_s4 + $0x58] sm:$0xff]  ;;  %vm606_vm5 = vcmask 523264   ;;  %vm679_vm6 = vcmask 64512   ;;  %vm1108_vm8 = vcmask 1043456  }
   0x8   :  { %1553 = vmatpush3.bf16.msra.mxu0 %v1552_v11  ;;  %v1573_v31 = vpack.c.bf16 %v32_v30, %v31_v29  ;;  %v1576_v34 = vpack.c.bf16 %v34_v33, %v33_v32  ;;  %v35_v35 = vld [vmem:[%s1954_s4 + $0x60] sm:$0xff]  ;;  %v36_v36 = vld [vmem:[%s1954_s4 + $0x68] sm:$0xff]  ;;  %v37_v38 = vld [vmem:[%s1954_s4 + $0x70] sm:$0xff]  ;;  %vm1104_vm9 = vcmask 31744   ;;  %s1665_s15 = smov [#allocation2]  }
   0x9   :  { %1563 = vmatprep.subr.bf16.mxu0 %v1662_v3  ;;  %1559 = vmatpush3.bf16.msra.mxu1 %v1558_v13  ;;  %v1579_v37 = vpack.c.bf16 %v36_v36, %v35_v35  ;;  %v38_v39 = vld [vmem:[%s1954_s4 + $0x78] sm:$0xff]  ;;  %v39_v40 = vld [vmem:[%s1954_s4 + $0x80] sm:$0xff]  ;;  %v40_v42 = vld [vmem:[%s1954_s4 + $0x88] sm:$0xff]  ;;  %s1267_s16 = sshll.u32 %s1665_s15, 4  ;;  %s1268_s16 = int_to_ptr.vmem [resolvable:$true] %s1267_s16 }
   0xa   :  { %1560 = vmatprep.subr.bf16.mxu1 %v1662_v3  ;;  %v1582_v41 = vpack.c.bf16 %v38_v39, %v37_v38  ;;  %v1585_v43 = vpack.c.bf16 %v40_v42, %v39_v40  ;;  %v1282_v48 = vld [vmem:[%s1954_s4 + $0x38] ss:$0 sm:$0xff]  ;;  %v43_v50 = vld [vmem:[%s1954_s4 + $0xa0] sm:$0xff]  ;;  %v44_v51 = vld [vmem:[%s1954_s4 + $0xa8] sm:$0xff]  ;;  %s1638_s17 = scalar_lea.vmem %s1268_s16, 128  ;;  %p1643_p1 = scmp.lt.s32.totalorder %s1268_s16, %s1268_s16 }
   0xb   :  { %1392 = vmatmul.mubr.msk.f32.vlgmr.msra.gmra.mrb[0].mxu0 %vm71_vm1, %v66_v16  ;;  %v1283_v52 = vld [vmem:[%s1954_s4 + $0x39] ss:$0 sm:$0xff]  ;;  %v1591_v54 = vpack.c.bf16 %v44_v51, %v43_v50  ;;  %v45_v56 = vld [vmem:[%s1954_s4 + $0xb0] sm:$0xff]  ;;  %v47_v59 = vld [vmem:[%s1954_s4 + $0xc0] sm:$0xff]  ;;  %p1639_p0 = scmp.ne.s32.totalorder %s1268_s16, %s1638_s17  ;;  %p1644_p2 = scmp.lt.s32.totalorder %s1638_s17, %s1638_s17 }
   0xc   :  { %1565 = vmatpush3.bf16.msra.mxu0 %v1555_v12  ;;  %1426 = vmatprep.mubr.msk.f32.mxu0 %vm1663_vm0, %v1664_v6  ;;  %v46_v57 = vld [vmem:[%s1954_s4 + $0xb8] sm:$0xff]  ;;  %v48_v60 = vld [vmem:[%s1954_s4 + $0xc8] sm:$0xff]  ;;  %v49_v62 = vld [vmem:[%s1954_s4 + $0xd0] sm:$0xff] }
   0xd   :  { %1566 = vmatprep.subr.bf16.mxu0 %v1662_v3  ;;  %1562 = vmatpush3.bf16.msra.mxu1 %v1561_v17  ;;  %v1594_v58 = vpack.c.bf16 %v46_v57, %v45_v56  ;;  %v1597_v61 = vpack.c.bf16 %v48_v60, %v47_v59  ;;  %v50_v63 = vld [vmem:[%s1954_s4 + $0xd8] sm:$0xff]  ;;  %v41_v1 = vld [vmem:[%s1954_s4 + $0x90] sm:$0xff]  ;;  %v64_v5 = vld [vmem:[%s1953_s3] sm:$0xff]  ;;  %p1645_p3 = por %p1644_p2, %p1643_p1 }
   0xe   :  { %1409 = vmatprep.subr.mxu1 %v1664_v6  ;;  %v1600_v0 = vpack.c.bf16 %v50_v63, %v49_v62  ;;  %v42_v2 = vld [vmem:[%s1954_s4 + $0x98] sm:$0xff]  ;;  %v65_v7 = vld [vmem:[%s1953_s3 + $0x8] sm:$0xff]  ;;  %v51_v15 = vld [vmem:[%s1954_s4 + $0xe0] sm:$0xff] }
   0xf   :  { %v1588_v4 = vpack.c.bf16 %v42_v2, %v41_v1  ;;  %vm1604_vm7 = vmpackc.low %vm71_vm1, %vm71_vm1  ;;  %v59_v35 = vld [vmem:[%s1954_s4 + $0x120] sm:$0xff]  ;;  %v62_v56 = vld [vmem:[%s1954_s4 + $0x138] sm:$0xff]  ;;  %p1646_p4 = pnand %p1645_p3, %p1639_p0 }
  0x10   :  { %1568 = vmatpush3.bf16.msra.mxu0 %v1558_v13  ;;  %v63_v57 = vld [vmem:[%s1954_s4 + $0x140] sm:$0xff]  ;;  %v28_v60 = vld [vmem:[%s1954_s4 + $0x30] sm:$0xf]  ;;  %v1184_v62 = vld [vmem:[%s1952_s2 + $0x8] sm:$0xff] }
  0x11   :  { %1569 = vmatprep.subr.bf16.mxu0 %v1662_v3  ;;  %v1620_v59 = vpack.c.bf16 %v63_v57, %v62_v56 }
  0x14   :  { %1571 = vmatpush3.bf16.msra.mxu0 %v1561_v17  ;;  %v52_v17 = vld [vmem:[%s1954_s4 + $0xe8] sm:$0xff] }
  0x15   :  { %1581 = vmatprep.subr.bf16.mxu0 %v1662_v3 }
  0xde   :  { %v1746_v18 = vpop.f32.mrb[0].mxu0 }
  0xdf   :  { %v1393_v19 = vpop.f32.mrb[1].mxu0  ;;  %1407 = vmatmul.mubr.msk.f32.vlgmr.msra.gmra.mrb[0].mxu1 %vm145_vm2, %v1746_v18 }
  0xe0   :  { %1411 = vmatprep.mubr.msk.f32.mxu1 %vm1663_vm0, %v1664_v6  ;;  %1410 = vmatpush3.msk.msra.mxu1 %vm223_vm3, %v27_v20  ;;  %v53_v19 = vld [vmem:[%s1954_s4 + $0xf0] sm:$0xff] }
  0xe1   :  { %1429 = vmatprep.subr.mxu1 %v1664_v6 }
 0x1b2   :  { %v215_v21 = vpop.f32.mrb[0].mxu1 }
 0x1b3   :  { %v1408_v22 = vpop.f32.mrb[1].mxu1  ;;  %1412 = vmatmul.mubr.msk.f32.vlgmr.msra.gmra.mrb[2].mxu1 %vm219_vm4, %v215_v21  ;;  %v56_v21 = vld [vmem:[%s1954_s4 + $0x108] sm:$0xff] }
 0x1b4   :  { %1430 = vmatpush3.msk.msra.mxu1 %vm223_vm3, %v27_v20  ;;  %1431 = vmatprep.mubr.msk.f32.mxu1 %vm1663_vm0, %v1664_v6  ;;  %v54_v20 = vld [vmem:[%s1954_s4 + $0xf8] sm:$0xff]  ;;  %v55_v22 = vld [vmem:[%s1954_s4 + $0x100] sm:$0xff] }
 0x1b5   :  { %1572 = vmatprep.subr.bf16.mxu1 %v1662_v3 }
 0x286   :  { %v293_v23 = vpop.f32.mrb[2].mxu1 }
 0x287   :  { %v297_v24 = vsub.f32 %v1746_v18, %v293_v23  ;;  %v1413_v25 = vpop.f32.mrb[3].mxu1 }
 0x289   :  { %v298_v26 = vmul.f32 %v297_v24, %v297_v24 }
 0x28b   :  { %1427 = vmatmul.mubr.msk.f32.vlgmr.msra.gmra.mrb[2].mxu0 %vm145_vm2, %v298_v26 }
 0x28c   :  { %1461 = vmatprep.mubr.msk.f32.mxu0 %vm1663_vm0, %v1664_v6  ;;  %1583 = vmatpush3.bf16.msra.mxu0 %v1582_v41 }
 0x28d   :  { %1584 = vmatprep.subr.bf16.mxu0 %v1662_v3 }
 0x290   :  { %1586 = vmatpush3.bf16.msra.mxu0 %v1585_v43 }
 0x291   :  { %1587 = vmatprep.subr.bf16.mxu0 %v1662_v3 }
 0x294   :  { %1589 = vmatpush3.bf16.msra.mxu0 %v1588_v4 }
 0x35e   :  { %v368_v27 = vpop.f32.mrb[2].mxu0 }
 0x35f   :  { %v1428_v28 = vpop.f32.mrb[3].mxu0  ;;  %1432 = vmatmul.mubr.msk.f32.vlgmr.msra.gmra.mrb[4].mxu1 %vm219_vm4, %v368_v27  ;;  %v58_v27 = vld [vmem:[%s1954_s4 + $0x118] sm:$0xff] }
 0x360   :  { %1446 = vmatprep.mubr.msk.f32.mxu1 %vm1663_vm0, %v1664_v6  ;;  %1574 = vmatpush3.bf16.msra.mxu1 %v1573_v31  ;;  %v57_v28 = vld [vmem:[%s1954_s4 + $0x110] sm:$0xff] }
 0x361   :  { %1575 = vmatprep.subr.bf16.mxu1 %v1662_v3 }
 0x364   :  { %1577 = vmatpush3.bf16.msra.mxu1 %v1576_v34 }
 0x365   :  { %1578 = vmatprep.subr.bf16.mxu1 %v1662_v3 }
 0x368   :  { %1580 = vmatpush3.bf16.msra.mxu1 %v1579_v37 }
 0x369   :  { %1590 = vmatprep.subr.bf16.mxu1 %v1662_v3 }
 0x432   :  { %v441_v44 = vpop.f32.mrb[4].mxu1 }
 0x433   :  { %v442_v45 = vadd.f32 1e-05, %v441_v44  ;;  %v1433_v46 = vpop.f32.mrb[5].mxu1 }
 0x435   :  { %1632 = vrsqrt.f32 %v442_v45 }
 0x43f   :  { %v1633_v47 = vpop.eup %1632 }
 0x440   :  { %v446_v49 = vmul.f32 %v1633_v47, %v297_v24 }
 0x442   :  { %v451_v53 = vmul.f32 %v1282_v48, %v446_v49 }
 0x444   :  { %v456_v55 = vadd.f32 %v1283_v52, %v451_v53  ;;  %v60_v53 = vld [vmem:[%s1954_s4 + $0x128] sm:$0xff] }
 0x446   :  { %1447 = vmatmul.mubr.msk.f32.vlgmr.msra.gmra.mrb[6].mxu1 %vm145_vm2, %v456_v55  ;;  %v457_v9 = vmul.f32 %v456_v55, %v64_v5  ;;  %v1185_v5 = vld [vmem:[%s1952_s2 + $0x10] sm:$0xff] }
 0x447   :  { %1592 = vmatpush3.bf16.msra.mxu1 %v1591_v54  ;;  %1480 = vmatprep.mubr.msk.f32.mxu1 %vm1663_vm0, %v1664_v6  ;;  %v61_v54 = vld [vmem:[%s1954_s4 + $0x130] sm:$0xff] }
 0x448   :  { %1593 = vmatprep.subr.bf16.mxu1 %v1662_v3  ;;  %v1617_v55 = vpack.c.bf16 %v61_v54, %v60_v53 }
 0x44b   :  { %1595 = vmatpush3.bf16.msra.mxu1 %v1594_v58 }
 0x44c   :  { %1596 = vmatprep.subr.bf16.mxu1 %v1662_v3 }
 0x44f   :  { %1598 = vmatpush3.bf16.msra.mxu1 %v1597_v61  ;;  %v1183_v61 = vld [vmem:[%s1952_s2] sm:$0xff] }
 0x450   :  { %1599 = vmatprep.subr.bf16.mxu1 %v1662_v3  ;;  %v1623_v63 = vpack.c.bf16 %v1184_v62, %v1183_v61 }
 0x453   :  { %1601 = vmatpush3.bf16.msra.mxu1 %v1600_v0 }
 0x454   :  { %1602 = vmatprep.subr.bf16.mxu1 %v1662_v3 }
 0x456   :  { %1481 = vmatmul.mubr.msk.f32.vlgmr.msra.gmra.mrb[8].mxu1 %vm606_vm5, %v1746_v18 }
 0x457   :  { %1507 = vmatprep.mubr.msk.f32.mxu1 %vm1663_vm0, %v1664_v6 }
 0x519   :  { %v527_v8 = vpop.f32.mrb[6].mxu1 }
 0x51a   :  { %v531_v10 = vmul.f32 %v527_v8, %v65_v7  ;;  %v1448_v11 = vpop.f32.mrb[7].mxu1  ;;  %v1186_v7 = vld [vmem:[%s1952_s2 + $0x18] sm:$0xff] }
 0x51b   :  { %v1626_v8 = vpack.c.bf16 %v1186_v7, %v1185_v5 }
 0x51c   :  { %v532_v12 = vadd.f32 %v531_v10, %v457_v9 }
 0x51e   :  { %1462 = vmatmul.mubr.msk.f32.vlgmr.msra.gmra.mrb[4].mxu0 %vm145_vm2, %v532_v12 }
 0x51f   :  { %1485 = vmatprep.mubr.msk.f32.mxu0 %vm679_vm6, %v51_v15 }
 0x529   :  { %v675_v13 = vpop.f32.mrb[8].mxu1 }
 0x52a   :  { %v1482_v14 = vpop.f32.mrb[9].mxu1 }
 0x5f1   :  { %v602_v16 = vpop.f32.mrb[4].mxu0 }
 0x5f2   :  { %v1463_v18 = vpop.f32.mrb[5].mxu0  ;;  %1483 = vmatprep.subr.mxu0 %v602_v16 }
 0x5f3   :  { %1484 = vmatpush3.msra.mxu0 %v602_v16 }
 0x5f4   :  { %1486 = vmatmul.mubr.msk.f32.vlgmr.msra.gmra.mrb[6].mxu0 %vm679_vm6, %v52_v17  ;;  %1491 = vmatprep.subr.mxu0 %v675_v13 }
 0x5f5   :  { %1492 = vmatpush3.msra.mxu0 %v675_v13  ;;  %1488 = vmatprep.mubr.msk.f32.mxu0 %vm679_vm6, %v53_v19 }
 0x5f6   :  { %1610 = vmatprep.subr.bf16.mxu0 %v1662_v3 }
 0x5f8   :  { %1489 = vmatmul.mubr.msk.f32.gmra.mrb[8].mxu0 %vm679_vm6, %v54_v20 }
 0x5f9   :  { %1493 = vmatprep.mubr.msk.f32.mxu0 %vm679_vm6, %v51_v15 }
 0x5fc   :  { %1494 = vmatmul.mubr.msk.f32.vlgmr.msra.gmra.mrb[10].mxu0 %vm679_vm6, %v52_v17 }
 0x5fd   :  { %1496 = vmatprep.mubr.msk.f32.mxu0 %vm679_vm6, %v53_v19 }
 0x600   :  { %1497 = vmatmul.mubr.msk.f32.gmra.mrb[12].mxu0 %vm679_vm6, %v54_v20 }
 0x601   :  { %1518 = vmatprep.mubr.msk.f32.mxu0 %vm1663_vm0, %v1664_v6 }
 0x6c7   :  { %v1487_v23 = vpop.f32.mrb[6].mxu0 }
 0x6c8   :  { %v778_v24 = vmul.f32 %v1487_v23, %v56_v21  ;;  %v758_v25 = vpop.f32.mrb[7].mxu0 }
 0x6c9   :  { %v777_v26 = vmul.f32 %v758_v25, %v55_v22 }
 0x6cb   :  { %v1603_v29 = vpack.c.bf16 %v778_v24, %v777_v26  ;;  %v1490_v30 = vpop.f32.mrb[8].mxu0 }
 0x6cc   :  { %v780_v31 = vmul.f32 %v1490_v30, %v58_v27  ;;  %v768_v32 = vpop.f32.mrb[9].mxu0 }
 0x6cd   :  { %1605 = vmatpush3.bf16.xpose.msk.msra.mxu1 %vm1604_vm7, %v1603_v29  ;;  %v779_v33 = vmul.f32 %v768_v32, %v57_v28 }
 0x6ce   :  { %1606 = vmatprep.subr.bf16.mxu1 %v1662_v3 }
 0x6cf   :  { %v1607_v34 = vpack.c.bf16 %v780_v31, %v779_v33  ;;  %v1495_v40 = vpop.f32.mrb[10].mxu0 }
 0x6d0   :  { %v847_v41 = vpop.f32.mrb[11].mxu0  ;;  %v867_v42 = vmul.f32 %v1495_v40, %v56_v21 }
 0x6d1   :  { %v866_v43 = vmul.f32 %v847_v41, %v55_v22 }
 0x6d3   :  { %v1498_v44 = vpop.f32.mrb[12].mxu0  ;;  %v1611_v45 = vpack.c.bf16 %v867_v42, %v866_v43 }
 0x6d4   :  { %v869_v46 = vmul.f32 %v1498_v44, %v58_v27  ;;  %v857_v47 = vpop.f32.mrb[13].mxu0 }
 0x6d5   :  { %1609 = vmatpush3.bf16.xpose.msk.msra.mxu1 %vm1604_vm7, %v1607_v34  ;;  %v868_v48 = vmul.f32 %v857_v47, %v57_v28  ;;  %1612 = vmatpush3.bf16.msra.mxu0 %v1611_v45 }
 0x6d6   :  { %1532 = vmatprep.subr.mxu1 %v1664_v6  ;;  %1613 = vmatprep.subr.bf16.mxu0 %v1662_v3 }
 0x6d7   :  { %v1614_v49 = vpack.c.bf16 %v869_v46, %v868_v48 }
 0x6d9   :  { %1615 = vmatpush3.bf16.msra.mxu0 %v1614_v49 }
 0x6da   :  { %1616 = vmatprep.subr.bf16.mxu0 %v1662_v3 }
 0x6dc   :  { %1508 = vmatmul.mubr.msk.f32.vlgmr.msra.gmra.mrb[10].mxu1 %vm71_vm1, %v532_v12 }
 0x6dd   :  { %1534 = vmatprep.mubr.msk.f32.mxu1 %vm1663_vm0, %v1664_v6  ;;  %1533 = vmatpush3.msk.msra.mxu1 %vm1108_vm8, %v28_v60 }
 0x7af   :  { %v950_v36 = vpop.f32.mrb[10].mxu1 }
 0x7b0   :  { %v951_v37 = vadd.f32 %v950_v36, %v59_v35  ;;  %v1509_v38 = vpop.f32.mrb[11].mxu1 }
 0x7b2   :  { %v954_v39 = vsel %vm71_vm1, %v951_v37, -inf }
 0x7b3   :  { %955 = vmax.xlane.f32.xlu0 %v954_v39 }
 0x840   :  { %v956_v50 = vpop.xlane.xlu0 %955 }
 0x841   :  { %v957_v51 = vsub.f32 %v951_v37, %v956_v50 }
 0x843   :  { %v958_v52 = vmul.f32 1.442695, %v957_v51 }
 0x845   :  { %1634 = vpow2.f32 %v958_v52 }
 0x84f   :  { %v1635_v58 = vpop.eup %1634 }
 0x850   :  { %1519 = vmatmul.mubr.msk.f32.vlgmr.msra.gmra.mrb[14].mxu0 %vm71_vm1, %v1635_v58 }
 0x851   :  { %1618 = vmatpush3.bf16.msra.mxu0 %v1617_v55  ;;  %1529 = vmatprep.mubr.msk.f32.mxu0 %vm1663_vm0, %v1664_v6 }
 0x852   :  { %1619 = vmatprep.subr.bf16.mxu0 %v1662_v3 }
 0x855   :  { %1621 = vmatpush3.bf16.msra.mxu0 %v1620_v59 }
 0x856   :  { %1622 = vmatprep.subr.bf16.mxu0 %v1662_v3 }
 0x858   :  { %1530 = vmatmul.mubr.msk.f32.vlgmr.msra.gmra.mrb[16].mxu0 %vm71_vm1, %v1635_v58 }
 0x859   :  { %1545 = vmatprep.mubr.msk.f32.mxu0 %vm1663_vm0, %v1664_v6  ;;  %1624 = vmatpush3.bf16.msra.mxu0 %v1623_v63 }
 0x85a   :  { %1625 = vmatprep.subr.bf16.mxu0 %v1662_v3 }
 0x85d   :  { %1627 = vmatpush3.bf16.msra.mxu0 %v1626_v8 }
 0x923   :  { %v1029_v0 = vpop.f32.mrb[14].mxu0 }
 0x924   :  { %v1520_v6 = vpop.f32.mrb[15].mxu0 }
 0x92b   :  { %v1099_v1 = vpop.f32.mrb[16].mxu0 }
 0x92c   :  { %1636 = vrcp.f32 %v1099_v1  ;;  %v1531_v2 = vpop.f32.mrb[17].mxu0 }
 0x936   :  { %v1637_v4 = vpop.eup %1636 }
 0x937   :  { %1535 = vmatmul.mubr.msk.f32.vlgmr.msra.gmra.mrb[12].mxu1 %vm1104_vm9, %v1637_v4 }
 0xa0a   :  { %v1178_v9 = vpop.f32.mrb[12].mxu1 }
 0xa0b   :  { %v1182_v3 = vmul.f32 %v1178_v9, %v1029_v0  ;;  %v1536_v10 = vpop.f32.mrb[13].mxu1 }
 0xa0d   :  { %1546 = vmatmul.mubr.msk.f32.vlgmr.msra.gmra.mrb[18].mxu0 %vm71_vm1, %v1182_v3 }
 0xae0   :  { %v1256_v11 = vpop.f32.mrb[18].mxu0 }
 0xae1   :  { %1260 = vst [vmem:[#allocation2] sm:$0xff] %v1256_v11  ;;  %v1547_v12 = vpop.f32.mrb[19].mxu0 }
 0xae2   :  { %1649 = shalt.err (!%p1646_p4)
}
 0xae3   :  { %s1650_s19 = scalar_lea.hbm %s1955_s5, 128 }
 0xae4   :  { %p1651_p5 = scmp.ne.s32.totalorder %s1955_s5, %s1650_s19  ;;  %p1654_p6 = scmp.lt.u32.totalorder %s1650_s19, %s1955_s5 }
 0xae6   :  { %p1656_p7 = pnand %p1654_p6, %p1651_p5 }
 0xae8   :  { %1659 = shalt.err (!%p1656_p7)
}
 0xae9   :  { %1270 = dma.vmem_to_hbm [thread:$0]  %s1268_s16, 128, %s1955_s5, [#allocation3]  }
 0xaea   :  { %1660 = dma.done.wait [#allocation3], 128  }
 0xaeb   :  { %1661 = vsyncadd [#allocation3], 4294967168 }
 0xaec   :  { %1274 = vsyncpa [#allocation3], 1 }

</bundles_post_ra>
